<compile_context>
chip_gen: v7x
topology: tpu7x:2x2x1
jax: 0.10.0
libtpu: 0.0.40
codegen_flags: <defaults>
</compile_context>

<pallas_src>
import functools

import jax
import jax.numpy as jnp
from jax import lax
from jax.experimental import pallas as pl
from jax.experimental.pallas import tpu as pltpu

_LANE = 128
_SMALL_HW_MAX = 128           # below this, per-sample matmuls waste MXU lanes
_SMALL_PATH_MAX_BYTES = 6 << 20


# --------------------------------------------------------------------------
# Generation-aware sizing helpers (all trace-time Python).
# --------------------------------------------------------------------------
def _device_kind():
    try:
        return jax.devices()[0].device_kind.lower()
    except Exception:
        return ""


def _is_multi_core_tc(kind):
    # v5e / v6e (and v2/v3 per-device) expose a single TensorCore; v4/v5p/v7x
    # have 2 TCs, where a "parallel" grid axis with >= 2 steps pays off.
    single = ("v5 lite", "v5e", "v6 lite", "v6e", "v2", "v3")
    return not any(tag in kind for tag in single)


def _x_block_budget_bytes(kind):
    # Per-gen x-block budget: HBM roofline saturates at ~512-1024 lane columns,
    # so these keep 2x double-buffered x blocks + f32 y tile + bf16 copy well
    # inside scoped VMEM (raised explicitly via vmem_limit_bytes) on every gen,
    # including v7x's 64 MiB physical VMEM.
    if "v6" in kind:
        return 8 << 20
    if "v5 lite" in kind or "v5e" in kind:
        return 4 << 20
    return 6 << 20            # v7x / unknown: conservative


def _choose_b_tile(n, multi_core):
    divs = [d for d in range(1, min(n, 8) + 1) if n % d == 0]
    if not multi_core or n < 2:
        return max(divs)                       # serial TC: maximize the tile
    cand = [d for d in divs if n // d >= 2]    # >= 2 steps for 2 TensorCores
    if not cand:
        return max(divs)
    even = [d for d in cand if (n // d) % 2 == 0]   # balanced megacore split
    return max(even) if even else max(cand)


def _choose_hw_tile(hw, per_col_bytes, budget):
    """Largest divisor of hw that is a multiple of 128 and fits the budget.
    (Multiples of 256 would be marginally better on v6e/v7x MXUs, but the
    largest fitting divisor dominates when HBM-bound.)"""
    max_cols = max(_LANE, budget // per_col_bytes)
    best = 0
    t = _LANE
    while t <= hw:
        if hw % t == 0 and t <= max_cols:
            best = t
        t += _LANE
    return best if best else _LANE


# --------------------------------------------------------------------------
# General path: grid over (batch tiles, HW tiles), resident GAP accumulator.
# --------------------------------------------------------------------------
def _general_kernel(x_ref, w_ref, b_ref, o_ref, acc_ref, *,
                    b_tile, cout_pad, hw_tile, inv_hw):
    hi = pl.program_id(1)

    @pl.when(hi == 0)
    def _init():
        acc_ref[...] = jnp.zeros_like(acc_ref)

    w_t = w_ref[...]                                       # (cout_pad, C) bf16
    # Hoist the bias broadcast out of the (unrolled) batch loop.
    bias_b = jnp.broadcast_to(b_ref[...], (cout_pad, hw_tile))

    def body(bb, carry):
        # f32 -> bf16 happens per-tile in VMEM (no separate HBM cast pass).
        xb = x_ref[bb].astype(jnp.bfloat16)                # (C, hw_tile)
        y = jnp.dot(w_t, xb, preferred_element_type=jnp.float32)   # (cout_pad, hw_tile)
        y = jnp.maximum(y + bias_b, 0.0)                   # 1x1 conv bias + ReLU
        # GAP partial over this HW tile (scale by 1/HW only at the end).
        acc_ref[bb] = acc_ref[bb] + jnp.sum(y, axis=1, keepdims=True)
        return carry

    lax.fori_loop(0, b_tile, body, 0, unroll=True)

    @pl.when(hi == pl.num_programs(1) - 1)
    def _finalize():
        # Single relayout to a lane-dense (b_tile, 1, cout_pad) output block.
        o_ref[...] = jnp.transpose(acc_ref[...], (0, 2, 1)) * inv_hw


def _general_call(x, w_pad, b_pad, n, c, hw, cout_pad, inv_hw, budget, kind, cost):
    x_bytes = x.dtype.itemsize
    multi = _is_multi_core_tc(kind)
    b_tile = _choose_b_tile(n, multi)

    if hw % _LANE == 0:
        hw_tile = _choose_hw_tile(hw, b_tile * c * x_bytes, budget)
    else:
        # Non-128-divisible HW: the block must span the full HW extent, so
        # shrink the batch tile instead of silently blowing the VMEM budget.
        hw_tile = hw
        while b_tile > 1 and b_tile * c * hw * x_bytes > budget:
            b_tile = max(d for d in range(1, b_tile) if n % d == 0)
        # TODO(synk): for HW that is both huge and not 128-divisible, a masked
        # HW padding scheme would be needed (plain zero-padding is incorrect:
        # padded columns would contribute ReLU(bias) to the GAP sum).

    grid_b, grid_hw = n // b_tile, hw // hw_tile

    xblk = b_tile * c * hw_tile * x_bytes
    yblk = cout_pad * hw_tile * 4
    need = (2 * xblk + xblk // 2 + 2 * yblk
            + 2 * (cout_pad * c * 2) + 2 * (b_tile * cout_pad * 4) + (2 << 20))
    vmem_limit = int(min(max(need, 16 << 20), 32 << 20))

    kernel = functools.partial(_general_kernel, b_tile=b_tile, cout_pad=cout_pad,
                               hw_tile=hw_tile, inv_hw=inv_hw)

    out = pl.pallas_call(
        kernel,
        out_shape=jax.ShapeDtypeStruct((n, 1, cout_pad), jnp.float32),
        grid_spec=pltpu.PrefetchScalarGridSpec(
            num_scalar_prefetch=0,
            grid=(grid_b, grid_hw),
            in_specs=[
                pl.BlockSpec((b_tile, c, hw_tile), lambda bi, hi: (bi, 0, hi)),
                pl.BlockSpec((cout_pad, c), lambda bi, hi: (0, 0)),
                pl.BlockSpec((cout_pad, 1), lambda bi, hi: (0, 0)),
            ],
            out_specs=pl.BlockSpec((b_tile, 1, cout_pad),
                                   lambda bi, hi: (bi, 0, 0)),
            scratch_shapes=[pltpu.VMEM((b_tile, cout_pad, 1), jnp.float32)],
        ),
        compiler_params=pltpu.CompilerParams(
            dimension_semantics=("parallel", "arbitrary"),
            vmem_limit_bytes=vmem_limit),
        cost_estimate=cost,
    )(x, w_pad, b_pad)
    return out.reshape(n, cout_pad)


# --------------------------------------------------------------------------
# Small-HW path (HW < 128): fold the batch into the matmul's N dimension.
# --------------------------------------------------------------------------
def _small_hw_kernel(x_ref, w_ref, b_ref, m_ref, o_ref, *, inv_hw):
    xb = x_ref[...].astype(jnp.bfloat16)                   # (C, N*HW)
    y = jnp.dot(w_ref[...], xb, preferred_element_type=jnp.float32)  # (cout_pad, N*HW)
    y = jnp.maximum(y + b_ref[...], 0.0)                   # bias + ReLU
    # Per-sample GAP as a tiny f32 matmul with a segment-ones matrix (avoids
    # odd in-kernel reshapes); columns of m select each sample's pixels.
    s = jnp.dot(y, m_ref[...], preferred_element_type=jnp.float32)   # (cout_pad, N)
    o_ref[...] = s * inv_hw


def _small_hw_call(x, w_pad, b_pad, n, c, hw, cout_pad, inv_hw, cost):
    # One wide W @ X matmul (full MXU/lane occupancy) instead of N narrow ones;
    # the wrapper transpose is negligible at these sizes.
    x2 = jnp.transpose(x, (1, 0, 2)).reshape(c, n * hw)
    m_seg = jnp.repeat(jnp.eye(n, dtype=jnp.float32), hw, axis=0)     # (N*HW, N)

    xbytes = x2.size * x2.dtype.itemsize
    need = 2 * xbytes + xbytes // 2 + 2 * (cout_pad * n * hw * 4) + (4 << 20)
    vmem_limit = int(min(max(need, 16 << 20), 32 << 20))

    out = pl.pallas_call(
        functools.partial(_small_hw_kernel, inv_hw=inv_hw),
        out_shape=jax.ShapeDtypeStruct((cout_pad, n), jnp.float32),
        grid=(1,),
        in_specs=[
            pl.BlockSpec((c, n * hw), lambda i: (0, 0)),
            pl.BlockSpec((cout_pad, c), lambda i: (0, 0)),
            pl.BlockSpec((cout_pad, 1), lambda i: (0, 0)),
            pl.BlockSpec((n * hw, n), lambda i: (0, 0)),
        ],
        out_specs=pl.BlockSpec((cout_pad, n), lambda i: (0, 0)),
        compiler_params=pltpu.CompilerParams(vmem_limit_bytes=vmem_limit),
        cost_estimate=cost,
    )(x2, w_pad, b_pad, m_seg)
    return out.T                                           # (N, cout_pad), tiny


# --------------------------------------------------------------------------
# Public wrapper:  reduce(1x1 conv + ReLU) -> GAP -> flatten.
# --------------------------------------------------------------------------
@functools.partial(jax.jit, static_argnames=("x_block_budget_bytes",))
def vgg_head_forward(x_nchw, w_oi, b_o, *, x_block_budget_bytes=None):
    """x_nchw: (N, 512, H, W); w_oi: (num_class, 512) or (num_class, 512, 1, 1)."""
    if w_oi.ndim == 4:                                     # Conv2d weight (O, I, 1, 1)
        w_oi = w_oi.reshape(w_oi.shape[0], w_oi.shape[1])
    n, c, h, w_sp = x_nchw.shape
    num_class = w_oi.shape[0]
    hw = h * w_sp
    inv_hw = 1.0 / float(hw)

    # Pad output channels to a lane-friendly multiple of 128; zero W rows and
    # zero bias give ReLU(0) = 0 -> zero GAP contribution, sliced off below.
    cout_pad = max(_LANE, ((num_class + _LANE - 1) // _LANE) * _LANE)
    w_pad = (jnp.zeros((cout_pad, c), jnp.bfloat16)
             .at[:num_class, :].set(w_oi.astype(jnp.bfloat16)))
    b_pad = (jnp.zeros((cout_pad, 1), jnp.float32)
             .at[:num_class, 0].set(b_o.astype(jnp.float32)))

    # NCHW -> (N, C, H*W): merging trailing contiguous dims is layout-free.
    # x stays in its native dtype; the kernel casts to bf16 per tile in VMEM.
    x = x_nchw.reshape(n, c, hw)
    x_bytes = x.dtype.itemsize

    kind = _device_kind()
    budget = (x_block_budget_bytes if x_block_budget_bytes is not None
              else _x_block_budget_bytes(kind))

    cost = pl.CostEstimate(
        flops=2 * n * cout_pad * c * hw,
        transcendentals=0,
        bytes_accessed=x.size * x_bytes + w_pad.size * 2 + b_pad.size * 4
        + n * cout_pad * 4)

    if hw < _SMALL_HW_MAX and n * c * hw * x_bytes <= _SMALL_PATH_MAX_BYTES:
        out = _small_hw_call(x, w_pad, b_pad, n, c, hw, cout_pad, inv_hw, cost)
    else:
        out = _general_call(x, w_pad, b_pad, n, c, hw, cout_pad, inv_hw,
                            budget, kind, cost)

    # Drop padded channels + flatten(..., 1).
    return out[:, :num_class].astype(x_nchw.dtype)


def reference_forward(x_nchw, w_oi, b_o):
    """Pure-JAX reference matching the PyTorch forward (features = identity)."""
    y = jnp.einsum("nchw,oc->nohw", x_nchw, w_oi) + b_o[None, :, None, None]
    y = jnp.maximum(y, 0.0)
    return jnp.mean(y, axis=(2, 3))        # AdaptiveAvgPool2d((1,1)) + flatten


if __name__ == "__main__":
    key = jax.random.PRNGKey(0)
    NUM_CLASS = 100
    C = 512                                # reduce conv requires 512 in-channels

    def run_case(n, h, w, **kw):
        case_key = jax.random.fold_in(key, n * 10000 + h * 100 + w)
        k_x, k_w, k_b = jax.random.split(case_key, 3)
        x = jax.random.normal(k_x, (n, C, h, w), jnp.float32)
        wt = jax.random.normal(k_w, (NUM_CLASS, C), jnp.float32) * (2.0 / C) ** 0.5
        b = jax.random.normal(k_b, (NUM_CLASS,), jnp.float32) * 0.01

        out = jax.block_until_ready(vgg_head_forward(x, wt, b, **kw))
        assert out.shape == (n, NUM_CLASS), out.shape

        # Tight check vs. a reference with the same bf16 rounding the kernel
        # applies before the MXU (both accumulate in f32).
        ref_q = reference_forward(x.astype(jnp.bfloat16).astype(jnp.float32),
                                  wt.astype(jnp.bfloat16).astype(jnp.float32), b)
        assert jnp.allclose(out, ref_q, atol=3e-3, rtol=3e-3), float(
            jnp.max(jnp.abs(out - ref_q)))

        # Loose check vs. full-f32 module semantics.
        ref = reference_forward(x, wt, b)
        assert jnp.allclose(out, ref, atol=5e-2, rtol=5e-2), float(
            jnp.max(jnp.abs(out - ref)))

    run_case(2, 4, 4)                                   # small-HW fused path
    run_case(2, 16, 8)                                  # general path, HW % 128 == 0
    run_case(2, 12, 12)                                 # general path, HW % 128 != 0
    run_case(4, 16, 16, x_block_budget_bytes=300_000)   # multi-step HW accumulation

    print("KERNEL_OK")
</pallas_src>

<mosaic_0001>
module attributes {stable_mosaic.version = 11 : i64} {
  func.func @_small_hw_kernel(%arg0: i32, %arg1: memref<512x32xf32, #tpu.memory_space<vmem>>, %arg2: memref<128x512xbf16, #tpu.memory_space<vmem>>, %arg3: memref<128x1xf32, #tpu.memory_space<vmem>>, %arg4: memref<32x2xf32, #tpu.memory_space<vmem>>, %arg5: memref<128x2xf32, #tpu.memory_space<vmem>>) attributes {dimension_semantics = [#tpu.dimension_semantics<arbitrary>], iteration_bounds = array<i64: 1>, scalar_prefetch = 0 : i64, scratch_operands = 0 : i64, tpu.core_type = #tpu.core_type<tc>, window_params = [{pipeline_mode = #tpu.pipeline_mode<synchronous>, transform_indices = @transform_0, window_bounds = array<i64: 512, 32>}, {pipeline_mode = #tpu.pipeline_mode<synchronous>, transform_indices = @transform_1, window_bounds = array<i64: 128, 512>}, {pipeline_mode = #tpu.pipeline_mode<synchronous>, transform_indices = @transform_2, window_bounds = array<i64: 128, 1>}, {pipeline_mode = #tpu.pipeline_mode<synchronous>, transform_indices = @transform_3, window_bounds = array<i64: 32, 2>}, {pipeline_mode = #tpu.pipeline_mode<synchronous>, transform_indices = @transform_4, window_bounds = array<i64: 128, 2>}]} {
    %c0 = arith.constant 0 : index
    %c0_0 = arith.constant 0 : index
    %0 = vector.load %arg1[%c0, %c0_0] : memref<512x32xf32, #tpu.memory_space<vmem>>, vector<512x32xf32>
    %1 = arith.truncf %0 : vector<512x32xf32> to vector<512x32xbf16>
    %c0_1 = arith.constant 0 : index
    %c0_2 = arith.constant 0 : index
    %2 = vector.load %arg2[%c0_1, %c0_2] : memref<128x512xbf16, #tpu.memory_space<vmem>>, vector<128x512xbf16>
    %cst = arith.constant dense<0.000000e+00> : vector<128x32xf32>
    %3 = tpu.matmul %2, %1, %cst {dimension_numbers = #tpu.dot_dimension_numbers<[1], [0], [0], [1], [0, 0, 1, 1], [], []>} : vector<128x512xbf16>, vector<512x32xbf16>, vector<128x32xf32> -> vector<128x32xf32>
    %c0_3 = arith.constant 0 : index
    %c0_4 = arith.constant 0 : index
    %4 = vector.load %arg3[%c0_3, %c0_4] : memref<128x1xf32, #tpu.memory_space<vmem>>, vector<128x1xf32>
    %5 = vector.broadcast %4 : vector<128x1xf32> to vector<128x32xf32>
    %6 = arith.addf %3, %5 : vector<128x32xf32>
    %cst_5 = arith.constant 0.000000e+00 : f32
    %7 = vector.broadcast %cst_5 : f32 to vector<128x32xf32>
    %8 = arith.maximumf %6, %7 : vector<128x32xf32>
    %c0_6 = arith.constant 0 : index
    %c0_7 = arith.constant 0 : index
    %9 = vector.load %arg4[%c0_6, %c0_7] : memref<32x2xf32, #tpu.memory_space<vmem>>, vector<32x2xf32>
    %cst_8 = arith.constant dense<0.000000e+00> : vector<128x2xf32>
    %10 = tpu.matmul %8, %9, %cst_8 {dimension_numbers = #tpu.dot_dimension_numbers<[1], [0], [0], [1], [0, 0, 1, 1], [], []>} : vector<128x32xf32>, vector<32x2xf32>, vector<128x2xf32> -> vector<128x2xf32>
    %cst_9 = arith.constant 6.250000e-02 : f32
    %11 = vector.broadcast %cst_9 : f32 to vector<128x2xf32>
    %12 = arith.mulf %10, %11 : vector<128x2xf32>
    %c0_10 = arith.constant 0 : index
    %c0_11 = arith.constant 0 : index
    %13 = vector.load %arg5[%c0_10, %c0_11] : memref<128x2xf32, #tpu.memory_space<vmem>>, vector<128x2xf32>
    tpu.vector_store %arg5[%c0_10, %c0_11], %12 {strides = array<i32>} : memref<128x2xf32, #tpu.memory_space<vmem>>, vector<128x2xf32>,
    return
  }
  func.func @transform_0(%arg0: i32) -> (i32, i32) {
    %c0_i32 = arith.constant 0 : i32
    %c0_i32_0 = arith.constant 0 : i32
    %c0_i32_1 = arith.constant 0 : i32
    return %c0_i32, %c0_i32_0 : i32, i32
  }
  func.func @transform_1(%arg0: i32) -> (i32, i32) {
    %c0_i32 = arith.constant 0 : i32
    %c0_i32_0 = arith.constant 0 : i32
    %c0_i32_1 = arith.constant 0 : i32
    return %c0_i32, %c0_i32_0 : i32, i32
  }
  func.func @transform_2(%arg0: i32) -> (i32, i32) {
    %c0_i32 = arith.constant 0 : i32
    %c0_i32_0 = arith.constant 0 : i32
    %c0_i32_1 = arith.constant 0 : i32
    return %c0_i32, %c0_i32_0 : i32, i32
  }
  func.func @transform_3(%arg0: i32) -> (i32, i32) {
    %c0_i32 = arith.constant 0 : i32
    %c0_i32_0 = arith.constant 0 : i32
    %c0_i32_1 = arith.constant 0 : i32
    return %c0_i32, %c0_i32_0 : i32, i32
  }
  func.func @transform_4(%arg0: i32) -> (i32, i32) {
    %c0_i32 = arith.constant 0 : i32
    %c0_i32_0 = arith.constant 0 : i32
    %c0_i32_1 = arith.constant 0 : i32
    return %c0_i32, %c0_i32_0 : i32, i32
  }
}

</mosaic_0001>

<bundles_post_ra>
// kernel: vgg_head_forward.1
= control target key start
LH: loop header
LB: loop body
LE: loop exit
PB: predicated region body
PF: predicated region fallthrough
CT: control target
= control target key end

     0   :  { %v1138_v3 = vmov 0   ;;  %vm616_vm0 = vcmask 261120   ;;  %vm826_vm1 = vcmask 15360   ;;  %s1598_s0 = inlined_call_operand.vmem [shape: f32[512,32], index: 0, kind: input, shape index: {}]   ;;  %s1599_s1 = inlined_call_operand.vmem [shape: bf16[128,512], index: 1, kind: input, shape index: {}]   ;;  %s1600_s2 = inlined_call_operand.vmem [shape: f32[128,1], index: 2, kind: input, shape index: {}]   ;;  %s1601_s3 = inlined_call_operand.vmem [shape: f32[32,2], index: 3, kind: input, shape index: {}]   ;;  %s1602_s4 = inlined_call_operand.vmem [shape: f32[128,2], index: 4, kind: output, shape index: {}]  }
   0x1   :  { %v34_v0 = vld [vmem:[%s1598_s0 + $0x80] sm:$0xff]  ;;  %v35_v1 = vld [vmem:[%s1598_s0 + $0x88] sm:$0xff]  ;;  %1088 = vset.pattern.permute.xlu0 %v1138_v3  ;;  %1089 = vset.pattern.permute.xlu1 %v1138_v3  ;;  %v36_v12 = vld [vmem:[%s1598_s0 + $0x90] sm:$0xff] }
   0x2   :  { %v66_v2 = vld [vmem:[%s1598_s0 + $0x180] sm:$0xff]  ;;  %v90_v4 = vpack.c.bf16 %v35_v1, %v34_v0  ;;  %v67_v5 = vld [vmem:[%s1598_s0 + $0x188] sm:$0xff]  ;;  %v37_v14 = vld [vmem:[%s1598_s0 + $0x98] sm:$0xff] }
   0x3   :  { %v18_v6 = vld [vmem:[%s1598_s0] sm:$0xff]  ;;  %v19_v7 = vld [vmem:[%s1598_s0 + $0x8] sm:$0xff]  ;;  %v106_v8 = vpack.c.bf16 %v67_v5, %v66_v2  ;;  %v68_v15 = vld [vmem:[%s1598_s0 + $0x190] sm:$0xff]  ;;  %v91_v17 = vpack.c.bf16 %v37_v14, %v36_v12 }
   0x4   :  { %v82_v9 = vpack.c.bf16 %v19_v7, %v18_v6  ;;  %v50_v10 = vld [vmem:[%s1598_s0 + $0x100] sm:$0xff]  ;;  %v51_v11 = vld [vmem:[%s1598_s0 + $0x108] sm:$0xff]  ;;  %895 = vmatprep.subr.bf16.mxu0 %v90_v4  ;;  %v69_v16 = vld [vmem:[%s1598_s0 + $0x198] sm:$0xff] }
   0x5   :  { %v98_v13 = vpack.c.bf16 %v51_v11, %v50_v10  ;;  %959 = vmatprep.subr.bf16.mxu1 %v106_v8  ;;  %v107_v18 = vpack.c.bf16 %v69_v16, %v68_v15  ;;  %v20_v19 = vld [vmem:[%s1598_s0 + $0x10] sm:$0xff]  ;;  %v21_v20 = vld [vmem:[%s1598_s0 + $0x18] sm:$0xff]  ;;  %v38_v24 = vld [vmem:[%s1598_s0 + $0xa0] sm:$0xff] }
   0x6   :  { %896 = vmatpush3.bf16.msra.mxu0 %v82_v9  ;;  %v52_v21 = vld [vmem:[%s1598_s0 + $0x110] sm:$0xff]  ;;  %v83_v22 = vpack.c.bf16 %v21_v20, %v20_v19  ;;  %v53_v23 = vld [vmem:[%s1598_s0 + $0x118] sm:$0xff]  ;;  %v39_v25 = vld [vmem:[%s1598_s0 + $0xa8] sm:$0xff] }
   0x7   :  { %960 = vmatpush3.bf16.msra.mxu1 %v98_v13  ;;  %897 = vmatprep.subr.bf16.mxu0 %v91_v17  ;;  %v99_v26 = vpack.c.bf16 %v53_v23, %v52_v21  ;;  %v92_v27 = vpack.c.bf16 %v39_v25, %v38_v24  ;;  %v70_v28 = vld [vmem:[%s1598_s0 + $0x1a0] sm:$0xff]  ;;  %v71_v29 = vld [vmem:[%s1598_s0 + $0x1a8] sm:$0xff]  ;;  %v40_v36 = vld [vmem:[%s1598_s0 + $0xb0] sm:$0xff] }
   0x8   :  { %961 = vmatprep.subr.bf16.mxu1 %v107_v18  ;;  %v22_v30 = vld [vmem:[%s1598_s0 + $0x20] sm:$0xff]  ;;  %v108_v31 = vpack.c.bf16 %v71_v29, %v70_v28  ;;  %v23_v32 = vld [vmem:[%s1598_s0 + $0x28] sm:$0xff]  ;;  %v41_v37 = vld [vmem:[%s1598_s0 + $0xb8] sm:$0xff] }
   0x9   :  { %v54_v33 = vld [vmem:[%s1598_s0 + $0x120] sm:$0xff]  ;;  %v55_v34 = vld [vmem:[%s1598_s0 + $0x128] sm:$0xff]  ;;  %v84_v35 = vpack.c.bf16 %v23_v32, %v22_v30  ;;  %v72_v38 = vld [vmem:[%s1598_s0 + $0x1b0] sm:$0xff]  ;;  %v93_v40 = vpack.c.bf16 %v41_v37, %v40_v36 }
   0xa   :  { %898 = vmatpush3.bf16.msra.mxu0 %v83_v22  ;;  %v100_v39 = vpack.c.bf16 %v55_v34, %v54_v33  ;;  %v73_v41 = vld [vmem:[%s1598_s0 + $0x1b8] sm:$0xff]  ;;  %v24_v42 = vld [vmem:[%s1598_s0 + $0x30] sm:$0xff]  ;;  %v42_v47 = vld [vmem:[%s1598_s0 + $0xc0] sm:$0xff] }
   0xb   :  { %962 = vmatpush3.bf16.msra.mxu1 %v99_v26  ;;  %899 = vmatprep.subr.bf16.mxu0 %v92_v27  ;;  %v25_v43 = vld [vmem:[%s1598_s0 + $0x38] sm:$0xff]  ;;  %v109_v44 = vpack.c.bf16 %v73_v41, %v72_v38  ;;  %v56_v45 = vld [vmem:[%s1598_s0 + $0x130] sm:$0xff]  ;;  %v43_v48 = vld [vmem:[%s1598_s0 + $0xc8] sm:$0xff] }
   0xc   :  { %963 = vmatprep.subr.bf16.mxu1 %v108_v31  ;;  %v57_v46 = vld [vmem:[%s1598_s0 + $0x138] sm:$0xff]  ;;  %v74_v49 = vld [vmem:[%s1598_s0 + $0x1c0] sm:$0xff]  ;;  %v75_v50 = vld [vmem:[%s1598_s0 + $0x1c8] sm:$0xff]  ;;  %v85_v51 = vpack.c.bf16 %v25_v43, %v24_v42  ;;  %v94_v53 = vpack.c.bf16 %v43_v48, %v42_v47 }
   0xd   :  { %v101_v52 = vpack.c.bf16 %v57_v46, %v56_v45  ;;  %v26_v54 = vld [vmem:[%s1598_s0 + $0x40] sm:$0xff]  ;;  %v27_v55 = vld [vmem:[%s1598_s0 + $0x48] sm:$0xff]  ;;  %v110_v57 = vpack.c.bf16 %v75_v50, %v74_v49  ;;  %v44_v59 = vld [vmem:[%s1598_s0 + $0xd0] sm:$0xff] }
   0xe   :  { %900 = vmatpush3.bf16.msra.mxu0 %v84_v35  ;;  %v58_v56 = vld [vmem:[%s1598_s0 + $0x140] sm:$0xff]  ;;  %v59_v58 = vld [vmem:[%s1598_s0 + $0x148] sm:$0xff]  ;;  %v45_v60 = vld [vmem:[%s1598_s0 + $0xd8] sm:$0xff]  ;;  %v86_v63 = vpack.c.bf16 %v27_v55, %v26_v54 }
   0xf   :  { %964 = vmatpush3.bf16.msra.mxu1 %v100_v39  ;;  %901 = vmatprep.subr.bf16.mxu0 %v93_v40  ;;  %v76_v61 = vld [vmem:[%s1598_s0 + $0x1d0] sm:$0xff]  ;;  %v77_v62 = vld [vmem:[%s1598_s0 + $0x1d8] sm:$0xff]  ;;  %v102_v1 = vpack.c.bf16 %v59_v58, %v58_v56  ;;  %v95_v2 = vpack.c.bf16 %v45_v60, %v44_v59  ;;  %v46_v7 = vld [vmem:[%s1598_s0 + $0xe0] sm:$0xff] }
  0x10   :  { %965 = vmatprep.subr.bf16.mxu1 %v109_v44  ;;  %v28_v0 = vld [vmem:[%s1598_s0 + $0x50] sm:$0xff]  ;;  %v29_v3 = vld [vmem:[%s1598_s0 + $0x58] sm:$0xff]  ;;  %v111_v6 = vpack.c.bf16 %v77_v62, %v76_v61  ;;  %v47_v8 = vld [vmem:[%s1598_s0 + $0xe8] sm:$0xff] }
  0x11   :  { %v60_v4 = vld [vmem:[%s1598_s0 + $0x150] sm:$0xff]  ;;  %v61_v5 = vld [vmem:[%s1598_s0 + $0x158] sm:$0xff]  ;;  %v78_v9 = vld [vmem:[%s1598_s0 + $0x1e0] sm:$0xff]  ;;  %v87_v13 = vpack.c.bf16 %v29_v3, %v28_v0  ;;  %v96_v18 = vpack.c.bf16 %v47_v8, %v46_v7 }
  0x12   :  { %902 = vmatpush3.bf16.msra.mxu0 %v85_v51  ;;  %v79_v10 = vld [vmem:[%s1598_s0 + $0x1e8] sm:$0xff]  ;;  %v30_v11 = vld [vmem:[%s1598_s0 + $0x60] sm:$0xff]  ;;  %v48_v16 = vld [vmem:[%s1598_s0 + $0xf0] sm:$0xff]  ;;  %v103_v17 = vpack.c.bf16 %v61_v5, %v60_v4 }
  0x13   :  { %966 = vmatpush3.bf16.msra.mxu1 %v101_v52  ;;  %903 = vmatprep.subr.bf16.mxu0 %v94_v53  ;;  %v31_v12 = vld [vmem:[%s1598_s0 + $0x68] sm:$0xff]  ;;  %v62_v14 = vld [vmem:[%s1598_s0 + $0x160] sm:$0xff]  ;;  %v49_v19 = vld [vmem:[%s1598_s0 + $0xf8] sm:$0xff]  ;;  %v112_v20 = vpack.c.bf16 %v79_v10, %v78_v9 }
  0x14   :  { %967 = vmatprep.subr.bf16.mxu1 %v110_v57  ;;  %v63_v15 = vld [vmem:[%s1598_s0 + $0x168] sm:$0xff]  ;;  %v80_v21 = vld [vmem:[%s1598_s0 + $0x1f0] sm:$0xff]  ;;  %v81_v23 = vld [vmem:[%s1598_s0 + $0x1f8] sm:$0xff]  ;;  %v88_v25 = vpack.c.bf16 %v31_v12, %v30_v11  ;;  %v97_v28 = vpack.c.bf16 %v49_v19, %v48_v16 }
  0x15   :  { %v1092_v22 = vld [vmem:[%s1599_s1 + $0x4] ss:$16 sps:$4 sm:$0xff]   ;;  %v1095_v24 = vld [vmem:[%s1599_s1 + $0xc] ss:$16 sps:$4 sm:$0xff]   ;;  %v104_v27 = vpack.c.bf16 %v63_v15, %v62_v14  ;;  %v113_v30 = vpack.c.bf16 %v81_v23, %v80_v21  ;;  %v1090_v35 = vld [vmem:[%s1599_s1] ss:$16 sps:$4 sm:$0xff]  }
  0x16   :  { %904 = vmatpush3.bf16.msra.mxu0 %v86_v63  ;;  %v32_v26 = vld [vmem:[%s1598_s0 + $0x70] sm:$0xff]  ;;  %434 = vmatprep.mubr.bf16.mxu0 %v1092_v22  ;;  %v33_v29 = vld [vmem:[%s1598_s0 + $0x78] sm:$0xff]  ;;  %v146_v43 = vld [vmem:[%s1600_s2] sm:$0xff] }
  0x17   :  { %968 = vmatpush3.bf16.msra.mxu1 %v102_v1  ;;  %905 = vmatprep.subr.bf16.mxu0 %v95_v2  ;;  %v64_v31 = vld [vmem:[%s1598_s0 + $0x170] sm:$0xff]  ;;  %v65_v32 = vld [vmem:[%s1598_s0 + $0x178] sm:$0xff]  ;;  %v89_v33 = vpack.c.bf16 %v33_v29, %v32_v26  ;;  %v147_v44 = vld [vmem:[%s1600_s2 + $0x8] sm:$0xff] }
  0x18   :  { %969 = vmatprep.subr.bf16.mxu1 %v111_v6  ;;  %531 = vmatprep.mubr.bf16.mxu1 %v1095_v24  ;;  %v105_v34 = vpack.c.bf16 %v65_v32, %v64_v31  ;;  %v1093_v36 = vld [vmem:[%s1599_s1 + $0x8] ss:$16 sps:$4 sm:$0xff]   ;;  %v1096_v37 = vld [vmem:[%s1599_s1 + $0x24] ss:$16 sps:$4 sm:$0xff]   ;;  %v1098_v38 = vld [vmem:[%s1599_s1 + $0x2c] ss:$16 sps:$4 sm:$0xff]  }
  0x19   :  { %v1100_v39 = vld [vmem:[%s1599_s1 + $0x20] ss:$16 sps:$4 sm:$0xff]   ;;  %v1101_v40 = vld [vmem:[%s1599_s1 + $0x28] ss:$16 sps:$4 sm:$0xff]   ;;  %v1102_v41 = vld [vmem:[%s1599_s1 + $0x44] ss:$16 sps:$4 sm:$0xff]   ;;  %164 = vperm.xlu0 %1088, %v146_v43   ;;  %169 = vperm.xlu1 %1089, %v147_v44  }
  0x1a   :  { %906 = vmatpush3.bf16.msra.mxu0 %v87_v13  ;;  %v1104_v42 = vld [vmem:[%s1599_s1 + $0x4c] ss:$16 sps:$4 sm:$0xff]   ;;  %v154_v45 = vld [vmem:[%s1600_s2 + $0x40] sm:$0xff]  ;;  %v1107_v48 = vld [vmem:[%s1599_s1 + $0x48] ss:$16 sps:$4 sm:$0xff]  }
  0x1b   :  { %970 = vmatpush3.bf16.msra.mxu1 %v103_v17  ;;  %907 = vmatprep.subr.bf16.mxu0 %v96_v18  ;;  %v155_v46 = vld [vmem:[%s1600_s2 + $0x48] sm:$0xff]  ;;  %v1106_v47 = vld [vmem:[%s1599_s1 + $0x40] ss:$16 sps:$4 sm:$0xff]   ;;  %v1108_v49 = vld [vmem:[%s1599_s1 + $0x64] ss:$16 sps:$4 sm:$0xff]  }
  0x1c   :  { %971 = vmatprep.subr.bf16.mxu1 %v112_v20  ;;  %v148_v50 = vld [vmem:[%s1600_s2 + $0x10] sm:$0xff]  ;;  %v612_v51 = vld [vmem:[%s1601_s3] sm:$0xff]  ;;  %v613_v52 = vld [vmem:[%s1601_s3 + $0x8] sm:$0xff] }
  0x1d   :  { %204 = vperm.xlu0 %1088, %v154_v45   ;;  %v1110_v53 = vld [vmem:[%s1599_s1 + $0x6c] ss:$16 sps:$4 sm:$0xff]   ;;  %209 = vperm.xlu1 %1089, %v155_v46   ;;  %v156_v54 = vld [vmem:[%s1600_s2 + $0x50] sm:$0xff]  ;;  %v1075_v55 = vpack.c.bf16 %v613_v52, %v612_v51  ;;  %v1113_v59 = vld [vmem:[%s1599_s1 + $0x68] ss:$16 sps:$4 sm:$0xff]  }
  0x1e   :  { %908 = vmatpush3.bf16.msra.mxu0 %v88_v25  ;;  %v149_v56 = vld [vmem:[%s1600_s2 + $0x18] sm:$0xff]  ;;  %v1112_v58 = vld [vmem:[%s1599_s1 + $0x60] ss:$16 sps:$4 sm:$0xff]   ;;  %v1114_v60 = vld [vmem:[%s1599_s1 + $0x84] ss:$16 sps:$4 sm:$0xff]  }
  0x1f   :  { %972 = vmatpush3.bf16.msra.mxu1 %v104_v27  ;;  %909 = vmatprep.subr.bf16.mxu0 %v97_v28  ;;  %v157_v57 = vld [vmem:[%s1600_s2 + $0x58] sm:$0xff]  ;;  %v150_v61 = vld [vmem:[%s1600_s2 + $0x20] sm:$0xff]  ;;  %v151_v0 = vld [vmem:[%s1600_s2 + $0x28] sm:$0xff] }
  0x20   :  { %973 = vmatprep.subr.bf16.mxu1 %v113_v30  ;;  %v1116_v62 = vld [vmem:[%s1599_s1 + $0x8c] ss:$16 sps:$4 sm:$0xff]   ;;  %v158_v63 = vld [vmem:[%s1600_s2 + $0x60] sm:$0xff]  ;;  %v1119_v3 = vld [vmem:[%s1599_s1 + $0x88] ss:$16 sps:$4 sm:$0xff]  }
  0x21   :  { %174 = vperm.xlu0 %1088, %v148_v50   ;;  %214 = vperm.xlu1 %1089, %v156_v54   ;;  %v159_v1 = vld [vmem:[%s1600_s2 + $0x68] sm:$0xff]  ;;  %v1118_v2 = vld [vmem:[%s1599_s1 + $0x80] ss:$16 sps:$4 sm:$0xff]   ;;  %v1120_v4 = vld [vmem:[%s1599_s1 + $0xa4] ss:$16 sps:$4 sm:$0xff]  }
  0x22   :  { %910 = vmatpush3.bf16.msra.mxu0 %v89_v33  ;;  %v152_v5 = vld [vmem:[%s1600_s2 + $0x30] sm:$0xff]  ;;  %v1122_v6 = vld [vmem:[%s1599_s1 + $0xac] ss:$16 sps:$4 sm:$0xff]   ;;  %v1125_v11 = vld [vmem:[%s1599_s1 + $0xa8] ss:$16 sps:$4 sm:$0xff]  }
  0x23   :  { %974 = vmatpush3.bf16.msra.mxu1 %v105_v34  ;;  %1076 = vmatprep.subr.bf16.mxu0 %v1075_v55  ;;  %v160_v7 = vld [vmem:[%s1600_s2 + $0x70] sm:$0xff]  ;;  %v153_v8 = vld [vmem:[%s1600_s2 + $0x38] sm:$0xff] }
  0x24   :  { %1083 = vmatprep.subr.bf16.mxu1 %v1075_v55  ;;  %v161_v9 = vld [vmem:[%s1600_s2 + $0x78] sm:$0xff]  ;;  %v1124_v10 = vld [vmem:[%s1599_s1 + $0xa0] ss:$16 sps:$4 sm:$0xff]   ;;  %v1126_v12 = vld [vmem:[%s1599_s1 + $0xc4] ss:$16 sps:$4 sm:$0xff]  }
  0x25   :  { %435 = vmatmul.mubr.bf16.vlgmr.msra.gmra.mrb[0].mxu0 %v1090_v35  ;;  %179 = vperm.xlu0 %1088, %v149_v56   ;;  %v1128_v13 = vld [vmem:[%s1599_s1 + $0xcc] ss:$16 sps:$4 sm:$0xff]   ;;  %v1130_v14 = vld [vmem:[%s1599_s1 + $0xc0] ss:$16 sps:$4 sm:$0xff]   ;;  %v1131_v15 = vld [vmem:[%s1599_s1 + $0xc8] ss:$16 sps:$4 sm:$0xff]  }
  0x26   :  { %532 = vmatmul.mubr.bf16.vlgmr.msra.gmra.mrb[0].mxu1 %v1093_v36  ;;  %442 = vmatprep.mubr.bf16.mxu0 %v1096_v37  ;;  %v1132_v16 = vld [vmem:[%s1599_s1 + $0xe4] ss:$16 sps:$4 sm:$0xff]   ;;  %v1134_v17 = vld [vmem:[%s1599_s1 + $0xec] ss:$16 sps:$4 sm:$0xff]   ;;  %v1136_v18 = vld [vmem:[%s1599_s1 + $0xe0] ss:$16 sps:$4 sm:$0xff]  }
  0x27   :  { %539 = vmatprep.mubr.bf16.mxu1 %v1098_v38  ;;  %1078 = vmatpush3.bf16.msra.mxu0 %v1075_v55  ;;  %v1137_v19 = vld [vmem:[%s1599_s1 + $0xe8] ss:$16 sps:$4 sm:$0xff]   ;;  %v614_v20 = vld [vmem:[%s1601_s3 + $0x10] sm:$0xff] }
  0x28   :  { %1085 = vmatpush3.bf16.msra.mxu1 %v1075_v55  ;;  %219 = vperm.xlu1 %1089, %v157_v57   ;;  %v615_v21 = vld [vmem:[%s1601_s3 + $0x18] sm:$0xff] }
  0x29   :  { %184 = vperm.xlu0 %1088, %v150_v61   ;;  %v1079_v22 = vpack.c.bf16 %v615_v21, %v614_v20 }
  0x2b   :  { %1080 = vmatprep.subr.bf16.mxu0 %v1079_v22  ;;  %1084 = vmatprep.subr.bf16.mxu1 %v1079_v22 }
  0x2c   :  { %224 = vperm.xlu1 %1089, %v158_v63   ;;  %1082 = vmatpush3.bf16.msra.mxu0 %v1079_v22 }
  0x2d   :  { %443 = vmatmul.mubr.bf16.gmra.mrb[4].mxu0 %v1100_v39  ;;  %189 = vperm.xlu0 %1088, %v151_v0  }
  0x2e   :  { %540 = vmatmul.mubr.bf16.gmra.mrb[4].mxu1 %v1101_v40  ;;  %450 = vmatprep.mubr.bf16.mxu0 %v1102_v41 }
  0x2f   :  { %547 = vmatprep.mubr.bf16.mxu1 %v1104_v42  ;;  %1086 = vmatpush3.bf16.msra.mxu1 %v1079_v22 }
  0x30   :  { %229 = vperm.xlu1 %1089, %v159_v1  }
  0x31   :  { %194 = vperm.xlu0 %1088, %v152_v5  }
  0x34   :  { %234 = vperm.xlu1 %1089, %v160_v7  }
  0x35   :  { %451 = vmatmul.mubr.bf16.gmra.mrb[8].mxu0 %v1106_v47  ;;  %199 = vperm.xlu0 %1088, %v153_v8  }
  0x36   :  { %548 = vmatmul.mubr.bf16.gmra.mrb[8].mxu1 %v1107_v48  ;;  %458 = vmatprep.mubr.bf16.mxu0 %v1108_v49 }
  0x37   :  { %555 = vmatprep.mubr.bf16.mxu1 %v1110_v53 }
  0x38   :  { %239 = vperm.xlu1 %1089, %v161_v9  }
  0x3d   :  { %459 = vmatmul.mubr.bf16.gmra.mrb[12].mxu0 %v1112_v58 }
  0x3e   :  { %556 = vmatmul.mubr.bf16.gmra.mrb[12].mxu1 %v1113_v59  ;;  %466 = vmatprep.mubr.bf16.mxu0 %v1114_v60 }
  0x3f   :  { %563 = vmatprep.mubr.bf16.mxu1 %v1116_v62 }
  0x45   :  { %467 = vmatmul.mubr.bf16.gmra.mrb[16].mxu0 %v1118_v2 }
  0x46   :  { %564 = vmatmul.mubr.bf16.gmra.mrb[16].mxu1 %v1119_v3  ;;  %474 = vmatprep.mubr.bf16.mxu0 %v1120_v4 }
  0x47   :  { %571 = vmatprep.mubr.bf16.mxu1 %v1122_v6 }
  0x4d   :  { %475 = vmatmul.mubr.bf16.gmra.mrb[20].mxu0 %v1124_v10 }
  0x4e   :  { %572 = vmatmul.mubr.bf16.gmra.mrb[20].mxu1 %v1125_v11  ;;  %482 = vmatprep.mubr.bf16.mxu0 %v1126_v12 }
  0x4f   :  { %579 = vmatprep.mubr.bf16.mxu1 %v1128_v13 }
  0x55   :  { %483 = vmatmul.mubr.bf16.gmra.mrb[24].mxu0 %v1130_v14 }
  0x56   :  { %580 = vmatmul.mubr.bf16.gmra.mrb[24].mxu1 %v1131_v15  ;;  %490 = vmatprep.mubr.bf16.mxu0 %v1132_v16 }
  0x57   :  { %587 = vmatprep.mubr.bf16.mxu1 %v1134_v17 }
  0x5d   :  { %491 = vmatmul.mubr.bf16.gmra.mrb[28].mxu0 %v1136_v18 }
  0x5e   :  { %588 = vmatmul.mubr.bf16.gmra.mrb[28].mxu1 %v1137_v19 }
  0x98   :  { %v165_v23 = vpop.permute.xlu0 %164  ;;  %v170_v27 = vpop.permute.xlu1 %169 }
  0x9c   :  { %v1512_v24 = vpop.permute.xlu0 %204  ;;  %v1516_v63 = vpop.permute.xlu1 %209 }
  0xa0   :  { %v175_v25 = vpop.permute.xlu0 %174  ;;  %v215_v19 = vpop.permute.xlu1 %214 }
  0xa4   :  { %v180_v26 = vpop.permute.xlu0 %179 }
  0xa8   :  { %v185_v29 = vpop.permute.xlu0 %184 }
  0xac   :  { %v190_v47 = vpop.permute.xlu0 %189 }
  0xb0   :  { %v195_v3 = vpop.permute.xlu0 %194 }
  0xf8   :  { %v911_v28 = vpop.f32.mrb[0].mxu0 }
  0xf9   :  { %v975_v30 = vpop.f32.mrb[0].mxu1  ;;  %v912_v31 = vpop.f32.mrb[1].mxu0 }
  0xfa   :  { %v913_v32 = vadd.f32 %v912_v31, %v911_v28  ;;  %v976_v33 = vpop.f32.mrb[1].mxu1  ;;  %v914_v34 = vpop.f32.mrb[2].mxu0 }
  0xfb   :  { %v977_v35 = vadd.f32 %v976_v33, %v975_v30  ;;  %v978_v36 = vpop.f32.mrb[2].mxu1  ;;  %v915_v37 = vpop.f32.mrb[3].mxu0 }
  0xfc   :  { %v437_v38 = vadd.f32 %v913_v32, %v165_v23  ;;  %v916_v39 = vadd.f32 %v915_v37, %v914_v34  ;;  %v979_v40 = vpop.f32.mrb[3].mxu1  ;;  %v200_v23 = vpop.permute.xlu0 %199 }
  0xfd   :  { %v980_v41 = vadd.f32 %v979_v40, %v978_v36  ;;  %v220_v40 = vpop.permute.xlu1 %219 }
  0xfe   :  { %v534_v42 = vadd.f32 %v977_v35, %v437_v38  ;;  %v440_v43 = vadd.f32 %v916_v39, %v170_v27 }
 0x100   :  { %v596_v44 = vmax.f32 %v534_v42, 0.0  ;;  %v537_v45 = vadd.f32 %v980_v41, %v440_v43  ;;  %v917_v46 = vpop.f32.mrb[4].mxu0 }
 0x101   :  { %v981_v48 = vpop.f32.mrb[4].mxu1  ;;  %v918_v49 = vpop.f32.mrb[5].mxu0 }
 0x102   :  { %v597_v50 = vmax.f32 %v537_v45, 0.0  ;;  %v919_v51 = vadd.f32 %v918_v49, %v917_v46  ;;  %v982_v52 = vpop.f32.mrb[5].mxu1  ;;  %v920_v53 = vpop.f32.mrb[6].mxu0  ;;  %1051 = vmatprep.mubr.msk.f32.mxu0 %vm616_vm0, %v596_v44 }
 0x103   :  { %v983_v54 = vadd.f32 %v982_v52, %v981_v48  ;;  %v984_v55 = vpop.f32.mrb[6].mxu1  ;;  %v921_v56 = vpop.f32.mrb[7].mxu0 }
 0x104   :  { %v445_v57 = vadd.f32 %v919_v51, %v175_v25  ;;  %v922_v58 = vadd.f32 %v921_v56, %v920_v53  ;;  %v985_v59 = vpop.f32.mrb[7].mxu1  ;;  %1052 = vmatmul.mubr.msk.f32.vlgmr.msra.gmra.mrb[32].mxu0 %vm616_vm0, %v597_v50 }
 0x105   :  { %v986_v60 = vadd.f32 %v985_v59, %v984_v55  ;;  %v225_v59 = vpop.permute.xlu1 %224 }
 0x106   :  { %v542_v61 = vadd.f32 %v983_v54, %v445_v57  ;;  %v448_v62 = vadd.f32 %v922_v58, %v180_v26 }
 0x108   :  { %v598_v0 = vmax.f32 %v542_v61, 0.0  ;;  %v545_v1 = vadd.f32 %v986_v60, %v448_v62  ;;  %v923_v2 = vpop.f32.mrb[8].mxu0 }
 0x109   :  { %v987_v4 = vpop.f32.mrb[8].mxu1  ;;  %v924_v5 = vpop.f32.mrb[9].mxu0 }
 0x10a   :  { %v599_v6 = vmax.f32 %v545_v1, 0.0  ;;  %v925_v7 = vadd.f32 %v924_v5, %v923_v2  ;;  %v988_v8 = vpop.f32.mrb[9].mxu1  ;;  %v926_v9 = vpop.f32.mrb[10].mxu0  ;;  %1054 = vmatprep.mubr.msk.f32.mxu0 %vm616_vm0, %v598_v0 }
 0x10b   :  { %v989_v10 = vadd.f32 %v988_v8, %v987_v4  ;;  %v990_v11 = vpop.f32.mrb[10].mxu1  ;;  %v927_v12 = vpop.f32.mrb[11].mxu0 }
 0x10c   :  { %v453_v13 = vadd.f32 %v925_v7, %v185_v29  ;;  %v928_v14 = vadd.f32 %v927_v12, %v926_v9  ;;  %v991_v15 = vpop.f32.mrb[11].mxu1  ;;  %1055 = vmatmul.mubr.msk.f32.gmra.mrb[34].mxu0 %vm616_vm0, %v599_v6 }
 0x10d   :  { %v992_v16 = vadd.f32 %v991_v15, %v990_v11 }
 0x10e   :  { %v550_v17 = vadd.f32 %v989_v10, %v453_v13  ;;  %v456_v18 = vadd.f32 %v928_v14, %v190_v47  ;;  %v230_v13 = vpop.permute.xlu1 %229 }
 0x110   :  { %v600_v20 = vmax.f32 %v550_v17, 0.0  ;;  %v553_v21 = vadd.f32 %v992_v16, %v456_v18  ;;  %v929_v22 = vpop.f32.mrb[12].mxu0 }
 0x111   :  { %v993_v25 = vpop.f32.mrb[12].mxu1  ;;  %v930_v26 = vpop.f32.mrb[13].mxu0 }
 0x112   :  { %v601_v27 = vmax.f32 %v553_v21, 0.0  ;;  %v931_v28 = vadd.f32 %v930_v26, %v929_v22  ;;  %v994_v30 = vpop.f32.mrb[13].mxu1  ;;  %v932_v31 = vpop.f32.mrb[14].mxu0  ;;  %1057 = vmatprep.mubr.msk.f32.mxu0 %vm616_vm0, %v600_v20 }
 0x113   :  { %v995_v29 = vadd.f32 %v994_v30, %v993_v25  ;;  %v996_v32 = vpop.f32.mrb[14].mxu1  ;;  %v933_v33 = vpop.f32.mrb[15].mxu0 }
 0x114   :  { %v461_v34 = vadd.f32 %v931_v28, %v195_v3  ;;  %v934_v35 = vadd.f32 %v933_v33, %v932_v31  ;;  %v997_v36 = vpop.f32.mrb[15].mxu1  ;;  %1058 = vmatmul.mubr.msk.f32.gmra.mrb[36].mxu0 %vm616_vm0, %v601_v27  ;;  %v235_v33 = vpop.permute.xlu1 %234 }
 0x115   :  { %v998_v37 = vadd.f32 %v997_v36, %v996_v32 }
 0x116   :  { %v558_v38 = vadd.f32 %v995_v29, %v461_v34  ;;  %v464_v39 = vadd.f32 %v934_v35, %v200_v23 }
 0x118   :  { %v602_v41 = vmax.f32 %v558_v38, 0.0  ;;  %v561_v42 = vadd.f32 %v998_v37, %v464_v39  ;;  %v935_v43 = vpop.f32.mrb[16].mxu0 }
 0x119   :  { %v999_v44 = vpop.f32.mrb[16].mxu1  ;;  %v936_v45 = vpop.f32.mrb[17].mxu0 }
 0x11a   :  { %v603_v46 = vmax.f32 %v561_v42, 0.0  ;;  %v937_v47 = vadd.f32 %v936_v45, %v935_v43  ;;  %v1000_v48 = vpop.f32.mrb[17].mxu1  ;;  %v938_v49 = vpop.f32.mrb[18].mxu0  ;;  %1060 = vmatprep.mubr.msk.f32.mxu0 %vm616_vm0, %v602_v41 }
 0x11b   :  { %v1001_v50 = vadd.f32 %v1000_v48, %v999_v44  ;;  %v1002_v51 = vpop.f32.mrb[18].mxu1  ;;  %v939_v52 = vpop.f32.mrb[19].mxu0 }
 0x11c   :  { %v469_v53 = vadd.f32 %v937_v47, %v1512_v24  ;;  %v940_v54 = vadd.f32 %v939_v52, %v938_v49  ;;  %v1003_v55 = vpop.f32.mrb[19].mxu1  ;;  %1061 = vmatmul.mubr.msk.f32.gmra.mrb[38].mxu0 %vm616_vm0, %v603_v46  ;;  %v240_v49 = vpop.permute.xlu1 %239 }
 0x11d   :  { %v1004_v56 = vadd.f32 %v1003_v55, %v1002_v51 }
 0x11e   :  { %v566_v57 = vadd.f32 %v1001_v50, %v469_v53  ;;  %v472_v58 = vadd.f32 %v940_v54, %v1516_v63 }
 0x120   :  { %v604_v60 = vmax.f32 %v566_v57, 0.0  ;;  %v569_v61 = vadd.f32 %v1004_v56, %v472_v58  ;;  %v941_v62 = vpop.f32.mrb[20].mxu0 }
 0x121   :  { %v1005_v0 = vpop.f32.mrb[20].mxu1  ;;  %v942_v1 = vpop.f32.mrb[21].mxu0 }
 0x122   :  { %v605_v2 = vmax.f32 %v569_v61, 0.0  ;;  %v943_v3 = vadd.f32 %v942_v1, %v941_v62  ;;  %v1006_v4 = vpop.f32.mrb[21].mxu1  ;;  %v944_v5 = vpop.f32.mrb[22].mxu0  ;;  %1063 = vmatprep.mubr.msk.f32.mxu1 %vm616_vm0, %v604_v60 }
 0x123   :  { %v1007_v24 = vadd.f32 %v1006_v4, %v1005_v0  ;;  %v1008_v6 = vpop.f32.mrb[22].mxu1  ;;  %v945_v7 = vpop.f32.mrb[23].mxu0 }
 0x124   :  { %v477_v8 = vadd.f32 %v943_v3, %v215_v19  ;;  %v946_v9 = vadd.f32 %v945_v7, %v944_v5  ;;  %v1009_v10 = vpop.f32.mrb[23].mxu1  ;;  %1064 = vmatmul.mubr.msk.f32.vlgmr.msra.gmra.mrb[32].mxu1 %vm616_vm0, %v605_v2 }
 0x125   :  { %v1010_v63 = vadd.f32 %v1009_v10, %v1008_v6 }
 0x126   :  { %v574_v11 = vadd.f32 %v1007_v24, %v477_v8  ;;  %v480_v12 = vadd.f32 %v946_v9, %v220_v40 }
 0x128   :  { %v606_v14 = vmax.f32 %v574_v11, 0.0  ;;  %v577_v15 = vadd.f32 %v1010_v63, %v480_v12  ;;  %v947_v16 = vpop.f32.mrb[24].mxu0 }
 0x129   :  { %v1011_v17 = vpop.f32.mrb[24].mxu1  ;;  %v948_v18 = vpop.f32.mrb[25].mxu0 }
 0x12a   :  { %v607_v20 = vmax.f32 %v577_v15, 0.0  ;;  %v949_v21 = vadd.f32 %v948_v18, %v947_v16  ;;  %v1012_v22 = vpop.f32.mrb[25].mxu1  ;;  %v950_v23 = vpop.f32.mrb[26].mxu0  ;;  %1066 = vmatprep.mubr.msk.f32.mxu1 %vm616_vm0, %v606_v14 }
 0x12b   :  { %v1013_v19 = vadd.f32 %v1012_v22, %v1011_v17  ;;  %v1014_v25 = vpop.f32.mrb[26].mxu1  ;;  %v951_v26 = vpop.f32.mrb[27].mxu0 }
 0x12c   :  { %v485_v27 = vadd.f32 %v949_v21, %v225_v59  ;;  %v952_v28 = vadd.f32 %v951_v26, %v950_v23  ;;  %v1015_v30 = vpop.f32.mrb[27].mxu1  ;;  %1067 = vmatmul.mubr.msk.f32.gmra.mrb[34].mxu1 %vm616_vm0, %v607_v20 }
 0x12d   :  { %v1016_v31 = vadd.f32 %v1015_v30, %v1014_v25 }
 0x12e   :  { %v582_v29 = vadd.f32 %v1013_v19, %v485_v27  ;;  %v488_v32 = vadd.f32 %v952_v28, %v230_v13 }
 0x130   :  { %v608_v34 = vmax.f32 %v582_v29, 0.0  ;;  %v585_v35 = vadd.f32 %v1016_v31, %v488_v32  ;;  %v953_v36 = vpop.f32.mrb[28].mxu0 }
 0x131   :  { %v1017_v37 = vpop.f32.mrb[28].mxu1  ;;  %v954_v38 = vpop.f32.mrb[29].mxu0 }
 0x132   :  { %v609_v39 = vmax.f32 %v585_v35, 0.0  ;;  %v955_v40 = vadd.f32 %v954_v38, %v953_v36  ;;  %v1018_v41 = vpop.f32.mrb[29].mxu1  ;;  %v956_v42 = vpop.f32.mrb[30].mxu0  ;;  %1069 = vmatprep.mubr.msk.f32.mxu1 %vm616_vm0, %v608_v34 }
 0x133   :  { %v1019_v43 = vadd.f32 %v1018_v41, %v1017_v37  ;;  %v1020_v44 = vpop.f32.mrb[30].mxu1  ;;  %v957_v45 = vpop.f32.mrb[31].mxu0 }
 0x134   :  { %v493_v46 = vadd.f32 %v955_v40, %v235_v33  ;;  %v958_v47 = vadd.f32 %v957_v45, %v956_v42  ;;  %v1021_v48 = vpop.f32.mrb[31].mxu1  ;;  %1070 = vmatmul.mubr.msk.f32.gmra.mrb[36].mxu1 %vm616_vm0, %v609_v39 }
 0x135   :  { %v1022_v50 = vadd.f32 %v1021_v48, %v1020_v44 }
 0x136   :  { %v590_v51 = vadd.f32 %v1019_v43, %v493_v46  ;;  %v496_v52 = vadd.f32 %v958_v47, %v240_v49 }
 0x138   :  { %v610_v53 = vmax.f32 %v590_v51, 0.0  ;;  %v593_v54 = vadd.f32 %v1022_v50, %v496_v52 }
 0x13a   :  { %v611_v55 = vmax.f32 %v593_v54, 0.0  ;;  %1072 = vmatprep.mubr.msk.f32.mxu1 %vm616_vm0, %v610_v53 }
 0x13c   :  { %1073 = vmatmul.mubr.msk.f32.gmra.mrb[38].mxu1 %vm616_vm0, %v611_v55 }
 0x1d7   :  { %v1053_v56 = vpop.f32.mrb[32].mxu0 }
 0x1d8   :  { %v811_v57 = vmul.f32 0.0625, %v1053_v56  ;;  %v731_v58 = vpop.f32.mrb[33].mxu0 }
 0x1d9   :  { %v810_v59 = vmul.f32 0.0625, %v731_v58 }
 0x1da   :  { %828 = vst.msk [vmem:[%s1602_s4 + $0x8] sm:$0xff] %vm826_vm1, %v811_v57 }
 0x1db   :  { %827 = vst.msk [vmem:[%s1602_s4] sm:$0xff] %vm826_vm1, %v810_v59 }
 0x1df   :  { %v1056_v60 = vpop.f32.mrb[34].mxu0 }
 0x1e0   :  { %v813_v61 = vmul.f32 0.0625, %v1056_v60  ;;  %v741_v62 = vpop.f32.mrb[35].mxu0 }
 0x1e1   :  { %v812_v0 = vmul.f32 0.0625, %v741_v62 }
 0x1e2   :  { %830 = vst.msk [vmem:[%s1602_s4 + $0x18] sm:$0xff] %vm826_vm1, %v813_v61 }
 0x1e3   :  { %829 = vst.msk [vmem:[%s1602_s4 + $0x10] sm:$0xff] %vm826_vm1, %v812_v0 }
 0x1e7   :  { %v1059_v1 = vpop.f32.mrb[36].mxu0 }
 0x1e8   :  { %v815_v2 = vmul.f32 0.0625, %v1059_v1  ;;  %v751_v3 = vpop.f32.mrb[37].mxu0 }
 0x1e9   :  { %v814_v4 = vmul.f32 0.0625, %v751_v3 }
 0x1ea   :  { %832 = vst.msk [vmem:[%s1602_s4 + $0x28] sm:$0xff] %vm826_vm1, %v815_v2 }
 0x1eb   :  { %831 = vst.msk [vmem:[%s1602_s4 + $0x20] sm:$0xff] %vm826_vm1, %v814_v4 }
 0x1ef   :  { %v1062_v5 = vpop.f32.mrb[38].mxu0 }
 0x1f0   :  { %v817_v24 = vmul.f32 0.0625, %v1062_v5  ;;  %v761_v6 = vpop.f32.mrb[39].mxu0 }
 0x1f1   :  { %v816_v7 = vmul.f32 0.0625, %v761_v6 }
 0x1f2   :  { %834 = vst.msk [vmem:[%s1602_s4 + $0x38] sm:$0xff] %vm826_vm1, %v817_v24 }
 0x1f3   :  { %833 = vst.msk [vmem:[%s1602_s4 + $0x30] sm:$0xff] %vm826_vm1, %v816_v7 }
 0x1f7   :  { %v1065_v8 = vpop.f32.mrb[32].mxu1 }
 0x1f8   :  { %v819_v9 = vmul.f32 0.0625, %v1065_v8  ;;  %v771_v10 = vpop.f32.mrb[33].mxu1 }
 0x1f9   :  { %v818_v63 = vmul.f32 0.0625, %v771_v10 }
 0x1fa   :  { %836 = vst.msk [vmem:[%s1602_s4 + $0x48] sm:$0xff] %vm826_vm1, %v819_v9 }
 0x1fb   :  { %835 = vst.msk [vmem:[%s1602_s4 + $0x40] sm:$0xff] %vm826_vm1, %v818_v63 }
 0x1ff   :  { %v1068_v11 = vpop.f32.mrb[34].mxu1 }
 0x200   :  { %v821_v12 = vmul.f32 0.0625, %v1068_v11  ;;  %v781_v13 = vpop.f32.mrb[35].mxu1 }
 0x201   :  { %v820_v14 = vmul.f32 0.0625, %v781_v13 }
 0x202   :  { %838 = vst.msk [vmem:[%s1602_s4 + $0x58] sm:$0xff] %vm826_vm1, %v821_v12 }
 0x203   :  { %837 = vst.msk [vmem:[%s1602_s4 + $0x50] sm:$0xff] %vm826_vm1, %v820_v14 }
 0x207   :  { %v1071_v15 = vpop.f32.mrb[36].mxu1 }
 0x208   :  { %v823_v16 = vmul.f32 0.0625, %v1071_v15  ;;  %v791_v17 = vpop.f32.mrb[37].mxu1 }
 0x209   :  { %v822_v18 = vmul.f32 0.0625, %v791_v17 }
 0x20a   :  { %840 = vst.msk [vmem:[%s1602_s4 + $0x68] sm:$0xff] %vm826_vm1, %v823_v16 }
 0x20b   :  { %839 = vst.msk [vmem:[%s1602_s4 + $0x60] sm:$0xff] %vm826_vm1, %v822_v18 }
 0x20f   :  { %v1074_v20 = vpop.f32.mrb[38].mxu1 }
 0x210   :  { %v825_v21 = vmul.f32 0.0625, %v1074_v20  ;;  %v801_v22 = vpop.f32.mrb[39].mxu1 }
 0x211   :  { %v824_v23 = vmul.f32 0.0625, %v801_v22 }
 0x212   :  { %842 = vst.msk [vmem:[%s1602_s4 + $0x78] sm:$0xff] %vm826_vm1, %v825_v21 }
 0x213   :  { %841 = vst.msk [vmem:[%s1602_s4 + $0x70] sm:$0xff] %vm826_vm1, %v824_v23 }

</bundles_post_ra>
